<compile_context>
chip_gen: v7x
topology: tpu7x:2x2x1
jax: 0.10.0
libtpu: 0.0.40
codegen_flags: <defaults>
</compile_context>

<pallas_src>
import jax
import jax.numpy as jnp
from jax import lax
from jax.experimental import pallas as pl
from jax.experimental.pallas import tpu as pltpu

_EPS = 1e-5


# --------------------------- VMEM budget helper ---------------------------- #
def _vmem_limit_bytes():
    """Generation-aware VMEM budget: ~3/4 of the core's VMEM, capped at 100 MiB
    (v5e/v6e: ~96 MiB; v7x / unknown: ~48 MiB)."""
    cap = None
    try:
        info = pltpu.get_tpu_info()
        for attr in ("vmem_capacity_bytes", "vmem_bytes", "vmem_size_bytes"):
            v = getattr(info, attr, None)
            if v:
                cap = int(v)
                break
    except Exception:
        cap = None
    if cap is None:
        cap = 64 * 1024 * 1024          # conservative: v7x per-core VMEM
    return int(max(32 * 1024 * 1024, min(cap * 3 // 4, 100 * 1024 * 1024)))


# ----------------------------- Pallas kernel ------------------------------- #
def _make_up_kernel(H2, W2):
    """Fused conv3x3 + InstanceNorm + AdaIN + ReLU for one batch element."""
    N = H2 * W2

    def kernel(x_ref, w_ref, mean_ref, std_ref, o_ref):
        # x_ref    : (3*Cin, (H2+2)*W2) bf16  dx-expanded, row-flattened image
        # w_ref    : (3, Cout, 3*Cin)   bf16  per-dy weight slabs, k = dx*Cin+c
        # mean_ref : (Cout, 1)          f32   AdaIN mean_y for this batch
        # std_ref  : (Cout, 1)          f32   AdaIN std_y  for this batch
        # o_ref    : (Cout, N)          bf16  lane-dense output (N % 128 == 0)

        # 3x3 conv as three accumulated MXU matmuls; the dy shift is a static
        # lane-slice of the flattened image (start dy*W2).  f32 accumulation.
        acc = jnp.dot(w_ref[0], x_ref[:, 0:N],
                      preferred_element_type=jnp.float32)
        for dy in (1, 2):
            tap = x_ref[:, dy * W2: dy * W2 + N]
            acc = acc + jnp.dot(w_ref[dy], tap,
                                preferred_element_type=jnp.float32)

        # One-pass InstanceNorm statistics over the lane axis (per channel).
        inv_n = jnp.float32(1.0 / N)
        s1 = jnp.sum(acc, axis=1, keepdims=True)                 # (Cout, 1)
        s2 = jnp.sum(acc * acc, axis=1, keepdims=True)           # (Cout, 1)
        mean = s1 * inv_n
        var = jnp.maximum(s2 * inv_n - mean * mean, 0.0)         # clamp >= 0

        # Fold InstanceNorm + AdaIN into one affine, then ReLU (one VPU pass).
        scale = std_ref[...] * lax.rsqrt(var + jnp.float32(_EPS))
        bias = mean_ref[...] - mean * scale
        o_ref[...] = jnp.maximum(acc * scale + bias, 0.0).astype(o_ref.dtype)

    return kernel


def up_pallas(xflat, w3, mean_b, std_b, *, H2, W2):
    """xflat: (B, 3*Cin, (H2+2)*W2) bf16; w3: (3, Cout, 3*Cin) bf16;
    mean_b/std_b: (B, Cout, 1) f32.  Returns (B, Cout, H2*W2) bf16."""
    B, K3, HPW = xflat.shape
    Cout = w3.shape[1]
    N = H2 * W2

    # TODO(synk): add an N-tiled grid axis ("arbitrary") with sum/sumsq VMEM
    # accumulators (two-pass finalize) for feature maps whose full-N block
    # exceeds the v7x VMEM budget; merge batch into the lane axis when Cout < 8
    # to amortize half-filled sublane tiles and the per-step grid overhead.
    return pl.pallas_call(
        _make_up_kernel(H2, W2),
        out_shape=jax.ShapeDtypeStruct((B, Cout, N), jnp.bfloat16),
        grid_spec=pltpu.PrefetchScalarGridSpec(
            num_scalar_prefetch=0,
            grid=(B,),
            in_specs=[
                pl.BlockSpec((None, K3, HPW), lambda b: (b, 0, 0)),
                pl.BlockSpec((3, Cout, K3), lambda b: (0, 0, 0)),
                pl.BlockSpec((None, Cout, 1), lambda b: (b, 0, 0)),
                pl.BlockSpec((None, Cout, 1), lambda b: (b, 0, 0)),
            ],
            out_specs=pl.BlockSpec((None, Cout, N), lambda b: (b, 0, 0)),
        ),
        compiler_params=pltpu.CompilerParams(
            dimension_semantics=("parallel",),
            vmem_limit_bytes=_vmem_limit_bytes(),
        ),
    )(xflat, w3, mean_b, std_b)


# ------------------------------ JAX glue ------------------------------------ #
def spectral_normalize(w):
    """One power-iteration spectral norm (approximates torch spectral_norm)."""
    # TODO(synk): PyTorch's spectral_norm keeps a persistent `u` vector updated
    # every forward; here we use one deterministic power iteration.
    out_nc = w.shape[0]
    wm = w.reshape(out_nc, -1)
    u = jax.random.normal(jax.random.PRNGKey(42), (out_nc,), jnp.float32)
    u = u / (jnp.linalg.norm(u) + 1e-12)
    v = wm.T @ u
    v = v / (jnp.linalg.norm(v) + 1e-12)
    u = wm @ v
    u = u / (jnp.linalg.norm(u) + 1e-12)
    sigma = u @ (wm @ v)
    return w / sigma


def up_forward(x_nchw, w_conv, mean_y, std_y):
    """Full Up.forward. x_nchw: (B, Cin, H, W); mean_y/std_y: (B, Cout, 1, 1).
    Returns (B, Cout, 2H, 2W) in bf16 (downstream decoder layers consume bf16)."""
    B, Cin, H, W = x_nchw.shape
    Cout = w_conv.shape[0]
    H2, W2 = 2 * H, 2 * W

    # Upsample x2, bilinear, align_corners=False (half-pixel centers), then
    # cast to bf16 so the pad / dx-expansion HBM round-trips run at half width.
    x = jax.image.resize(x_nchw.astype(jnp.float32), (B, Cin, H2, W2),
                         method="bilinear").astype(jnp.bfloat16)

    # ReflectionPad2d(1) -> (B, Cin, H2+2, W2+2).
    xp = jnp.pad(x, ((0, 0), (0, 0), (1, 1), (1, 1)), mode="reflect")

    # dx-expansion only (3x, not 9x): channel k = dx*Cin + c holds the padded
    # image shifted by dx along W and trimmed to W2 columns.  Row-major flatten
    # of (H2+2, W2) makes the in-kernel dy shift a pure lane offset of dy*W2.
    # TODO(synk): fold the dx shift (and ultimately the 2x bilinear upsample +
    # reflection pad, fixed 0.25/0.75 weights) into the kernel to cut the
    # remaining wrapper HBM round-trips; kept here so the conv stays a clean
    # 2-D MXU matmul with no in-kernel relayouts.
    xcol = jnp.concatenate([xp[:, :, :, dx:dx + W2] for dx in range(3)], axis=1)
    xflat = xcol.reshape(B, 3 * Cin, (H2 + 2) * W2)

    # Spectral-normalized conv weight, regrouped per dy: w3[dy, o, dx*Cin + c].
    w_sn = spectral_normalize(w_conv.astype(jnp.float32))
    w3 = jnp.transpose(w_sn, (2, 0, 3, 1)).reshape(3, Cout, 3 * Cin)
    w3 = w3.astype(jnp.bfloat16)

    # AdaIN parameters: (B, Cout, 1, 1) -> (B, Cout, 1), kept in f32.
    mean_b = mean_y.reshape(B, Cout, 1).astype(jnp.float32)
    std_b = std_y.reshape(B, Cout, 1).astype(jnp.float32)

    y = up_pallas(xflat, w3, mean_b, std_b, H2=H2, W2=W2)   # (B, Cout, N) bf16

    # (B, Cout, H2*W2) is already NCHW row-major: free reshape, no transpose.
    return y.reshape(B, Cout, H2, W2)


def up_reference(x_nchw, w_conv, mean_y, std_y):
    """Pure-XLA f32 reference of Up.forward (for the tolerance check)."""
    B, Cin, H, W = x_nchw.shape
    H2, W2 = 2 * H, 2 * W
    x = jax.image.resize(x_nchw.astype(jnp.float32), (B, Cin, H2, W2),
                         method="bilinear")
    xp = jnp.pad(x, ((0, 0), (0, 0), (1, 1), (1, 1)), mode="reflect")
    w_sn = spectral_normalize(w_conv.astype(jnp.float32))
    y = lax.conv_general_dilated(xp, w_sn, window_strides=(1, 1),
                                 padding="VALID",
                                 dimension_numbers=("NCHW", "OIHW", "NCHW"))
    mean = jnp.mean(y, axis=(2, 3), keepdims=True)
    var = jnp.var(y, axis=(2, 3), keepdims=True)
    y = (y - mean) * lax.rsqrt(var + _EPS)
    y = y * std_y + mean_y
    return jnp.maximum(y, 0.0)


# ------------------------------- main --------------------------------------- #
if __name__ == "__main__":
    B, in_nc, out_nc, H, W = 2, 4, 4, 16, 16

    key = jax.random.PRNGKey(0)
    kx, kw, km, ks = jax.random.split(key, 4)

    x = jax.random.normal(kx, (B, in_nc, H, W), jnp.float32)

    # Conv2d weight, deterministic init (kaiming-uniform-like bound).
    fan_in = in_nc * 3 * 3
    bound = 1.0 / (fan_in ** 0.5)
    w_conv = jax.random.uniform(kw, (out_nc, in_nc, 3, 3), jnp.float32,
                                minval=-bound, maxval=bound)

    # AdaIN statistics (set via update_mean_std in PyTorch).
    mean_y = jax.random.normal(km, (B, out_nc, 1, 1), jnp.float32)
    std_y = jax.random.uniform(ks, (B, out_nc, 1, 1), jnp.float32,
                               minval=0.5, maxval=1.5)

    out = jax.block_until_ready(up_forward(x, w_conv, mean_y, std_y))
    assert out.shape == (B, out_nc, 2 * H, 2 * W), out.shape
    out_f32 = out.astype(jnp.float32)
    assert bool(jnp.all(jnp.isfinite(out_f32)))

    # Loose tolerance vs. a pure-XLA f32 reference (kernel runs the conv in
    # bf16 and stores bf16, so allow a generous absolute budget).
    ref = jax.block_until_ready(up_reference(x, w_conv, mean_y, std_y))
    max_err = float(jnp.max(jnp.abs(out_f32 - ref)))
    assert max_err < 0.3, f"max abs error vs f32 reference: {max_err}"

    print("KERNEL_OK")
</pallas_src>

<mosaic_0001>
module attributes {stable_mosaic.version = 11 : i64} {
  func.func @kernel(%arg0: i32, %arg1: memref<1x12x1088xbf16, #tpu.memory_space<vmem>>, %arg2: memref<3x4x12xbf16, #tpu.memory_space<vmem>>, %arg3: memref<1x4x1xf32, #tpu.memory_space<vmem>>, %arg4: memref<1x4x1xf32, #tpu.memory_space<vmem>>, %arg5: memref<1x4x1024xbf16, #tpu.memory_space<vmem>>) attributes {dimension_semantics = [#tpu.dimension_semantics<parallel>], iteration_bounds = array<i64: 2>, scalar_prefetch = 0 : i64, scratch_operands = 0 : i64, tpu.core_type = #tpu.core_type<tc>, window_params = [{transform_indices = @transform_0, window_bounds = array<i64: 1, 12, 1088>}, {pipeline_mode = #tpu.pipeline_mode<synchronous>, transform_indices = @transform_1, window_bounds = array<i64: 3, 4, 12>}, {transform_indices = @transform_2, window_bounds = array<i64: 1, 4, 1>}, {transform_indices = @transform_3, window_bounds = array<i64: 1, 4, 1>}, {transform_indices = @transform_4, window_bounds = array<i64: 1, 4, 1024>}]} {
    %c0 = arith.constant 0 : index
    %c0_0 = arith.constant 0 : index
    %c0_1 = arith.constant 0 : index
    %0 = vector.load %arg2[%c0, %c0_0, %c0_1] : memref<3x4x12xbf16, #tpu.memory_space<vmem>>, vector<1x4x12xbf16>
    %1 = vector.shape_cast %0 : vector<1x4x12xbf16> to vector<4x12xbf16>
    %c0_2 = arith.constant 0 : index
    %c0_3 = arith.constant 0 : index
    %c0_4 = arith.constant 0 : index
    %2 = vector.load %arg1[%c0_2, %c0_3, %c0_4] : memref<1x12x1088xbf16, #tpu.memory_space<vmem>>, vector<1x12x1024xbf16>
    %3 = vector.shape_cast %2 : vector<1x12x1024xbf16> to vector<12x1024xbf16>
    %cst = arith.constant dense<0.000000e+00> : vector<4x1024xf32>
    %4 = tpu.matmul %1, %3, %cst {dimension_numbers = #tpu.dot_dimension_numbers<[1], [0], [0], [1], [0, 0, 1, 1], [], []>} : vector<4x12xbf16>, vector<12x1024xbf16>, vector<4x1024xf32> -> vector<4x1024xf32>
    %c0_5 = arith.constant 0 : index
    %c0_6 = arith.constant 0 : index
    %c32 = arith.constant 32 : index
    %5 = vector.load %arg1[%c0_5, %c0_6, %c32] : memref<1x12x1088xbf16, #tpu.memory_space<vmem>>, vector<1x12x1024xbf16>
    %6 = vector.shape_cast %5 : vector<1x12x1024xbf16> to vector<12x1024xbf16>
    %c1 = arith.constant 1 : index
    %c0_7 = arith.constant 0 : index
    %c0_8 = arith.constant 0 : index
    %7 = vector.load %arg2[%c1, %c0_7, %c0_8] : memref<3x4x12xbf16, #tpu.memory_space<vmem>>, vector<1x4x12xbf16>
    %8 = vector.shape_cast %7 : vector<1x4x12xbf16> to vector<4x12xbf16>
    %cst_9 = arith.constant dense<0.000000e+00> : vector<4x1024xf32>
    %9 = tpu.matmul %8, %6, %cst_9 {dimension_numbers = #tpu.dot_dimension_numbers<[1], [0], [0], [1], [0, 0, 1, 1], [], []>} : vector<4x12xbf16>, vector<12x1024xbf16>, vector<4x1024xf32> -> vector<4x1024xf32>
    %10 = arith.addf %4, %9 : vector<4x1024xf32>
    %c0_10 = arith.constant 0 : index
    %c0_11 = arith.constant 0 : index
    %c64 = arith.constant 64 : index
    %11 = vector.load %arg1[%c0_10, %c0_11, %c64] : memref<1x12x1088xbf16, #tpu.memory_space<vmem>>, vector<1x12x1024xbf16>
    %12 = vector.shape_cast %11 : vector<1x12x1024xbf16> to vector<12x1024xbf16>
    %c2 = arith.constant 2 : index
    %c0_12 = arith.constant 0 : index
    %c0_13 = arith.constant 0 : index
    %13 = vector.load %arg2[%c2, %c0_12, %c0_13] : memref<3x4x12xbf16, #tpu.memory_space<vmem>>, vector<1x4x12xbf16>
    %14 = vector.shape_cast %13 : vector<1x4x12xbf16> to vector<4x12xbf16>
    %cst_14 = arith.constant dense<0.000000e+00> : vector<4x1024xf32>
    %15 = tpu.matmul %14, %12, %cst_14 {dimension_numbers = #tpu.dot_dimension_numbers<[1], [0], [0], [1], [0, 0, 1, 1], [], []>} : vector<4x12xbf16>, vector<12x1024xbf16>, vector<4x1024xf32> -> vector<4x1024xf32>
    %16 = arith.addf %10, %15 : vector<4x1024xf32>
    %cst_15 = arith.constant dense<0.000000e+00> : vector<4xf32>
    %17 = vector.multi_reduction <add>, %16, %cst_15 [1] : vector<4x1024xf32> to vector<4xf32>
    %18 = vector.shape_cast %17 : vector<4xf32> to vector<4x1xf32>
    %19 = arith.mulf %16, %16 : vector<4x1024xf32>
    %cst_16 = arith.constant dense<0.000000e+00> : vector<4xf32>
    %20 = vector.multi_reduction <add>, %19, %cst_16 [1] : vector<4x1024xf32> to vector<4xf32>
    %21 = vector.shape_cast %20 : vector<4xf32> to vector<4x1xf32>
    %cst_17 = arith.constant 9.765625E-4 : f32
    %22 = vector.broadcast %cst_17 : f32 to vector<4x1xf32>
    %23 = arith.mulf %18, %22 : vector<4x1xf32>
    %cst_18 = arith.constant 9.765625E-4 : f32
    %24 = vector.broadcast %cst_18 : f32 to vector<4x1xf32>
    %25 = arith.mulf %21, %24 : vector<4x1xf32>
    %26 = arith.mulf %23, %23 : vector<4x1xf32>
    %27 = arith.subf %25, %26 : vector<4x1xf32>
    %cst_19 = arith.constant 0.000000e+00 : f32
    %28 = vector.broadcast %cst_19 : f32 to vector<4x1xf32>
    %29 = arith.maximumf %27, %28 : vector<4x1xf32>
    %c0_20 = arith.constant 0 : index
    %c0_21 = arith.constant 0 : index
    %c0_22 = arith.constant 0 : index
    %30 = vector.load %arg4[%c0_20, %c0_21, %c0_22] : memref<1x4x1xf32, #tpu.memory_space<vmem>>, vector<1x4x1xf32>
    %31 = vector.shape_cast %30 : vector<1x4x1xf32> to vector<4x1xf32>
    %cst_23 = arith.constant 9.99999974E-6 : f32
    %32 = vector.broadcast %cst_23 : f32 to vector<4x1xf32>
    %33 = arith.addf %29, %32 : vector<4x1xf32>
    %34 = math.rsqrt %33 : vector<4x1xf32>
    %35 = arith.mulf %31, %34 : vector<4x1xf32>
    %c0_24 = arith.constant 0 : index
    %c0_25 = arith.constant 0 : index
    %c0_26 = arith.constant 0 : index
    %36 = vector.load %arg3[%c0_24, %c0_25, %c0_26] : memref<1x4x1xf32, #tpu.memory_space<vmem>>, vector<1x4x1xf32>
    %37 = vector.shape_cast %36 : vector<1x4x1xf32> to vector<4x1xf32>
    %38 = arith.mulf %23, %35 : vector<4x1xf32>
    %39 = arith.subf %37, %38 : vector<4x1xf32>
    %40 = vector.broadcast %35 : vector<4x1xf32> to vector<4x1024xf32>
    %41 = arith.mulf %16, %40 : vector<4x1024xf32>
    %42 = vector.broadcast %39 : vector<4x1xf32> to vector<4x1024xf32>
    %43 = arith.addf %41, %42 : vector<4x1024xf32>
    %cst_27 = arith.constant 0.000000e+00 : f32
    %44 = vector.broadcast %cst_27 : f32 to vector<4x1024xf32>
    %45 = arith.maximumf %43, %44 : vector<4x1024xf32>
    %46 = arith.truncf %45 : vector<4x1024xf32> to vector<4x1024xbf16>
    %c0_28 = arith.constant 0 : index
    %c0_29 = arith.constant 0 : index
    %c0_30 = arith.constant 0 : index
    %47 = vector.load %arg5[%c0_28, %c0_29, %c0_30] : memref<1x4x1024xbf16, #tpu.memory_space<vmem>>, vector<1x4x1024xbf16>
    %48 = vector.shape_cast %47 : vector<1x4x1024xbf16> to vector<4x1024xbf16>
    %49 = vector.shape_cast %46 : vector<4x1024xbf16> to vector<1x4x1024xbf16>
    tpu.vector_store %arg5[%c0_28, %c0_29, %c0_30], %49 {strides = array<i32>} : memref<1x4x1024xbf16, #tpu.memory_space<vmem>>, vector<1x4x1024xbf16>,
    return
  }
  func.func @transform_0(%arg0: i32) -> (i32, i32, i32) {
    %c0_i32 = arith.constant 0 : i32
    %c0_i32_0 = arith.constant 0 : i32
    %c0_i32_1 = arith.constant 0 : i32
    return %arg0, %c0_i32, %c0_i32_0 : i32, i32, i32
  }
  func.func @transform_1(%arg0: i32) -> (i32, i32, i32) {
    %c0_i32 = arith.constant 0 : i32
    %c0_i32_0 = arith.constant 0 : i32
    %c0_i32_1 = arith.constant 0 : i32
    %c0_i32_2 = arith.constant 0 : i32
    return %c0_i32, %c0_i32_0, %c0_i32_1 : i32, i32, i32
  }
  func.func @transform_2(%arg0: i32) -> (i32, i32, i32) {
    %c0_i32 = arith.constant 0 : i32
    %c0_i32_0 = arith.constant 0 : i32
    %c0_i32_1 = arith.constant 0 : i32
    return %arg0, %c0_i32, %c0_i32_0 : i32, i32, i32
  }
  func.func @transform_3(%arg0: i32) -> (i32, i32, i32) {
    %c0_i32 = arith.constant 0 : i32
    %c0_i32_0 = arith.constant 0 : i32
    %c0_i32_1 = arith.constant 0 : i32
    return %arg0, %c0_i32, %c0_i32_0 : i32, i32, i32
  }
  func.func @transform_4(%arg0: i32) -> (i32, i32, i32) {
    %c0_i32 = arith.constant 0 : i32
    %c0_i32_0 = arith.constant 0 : i32
    %c0_i32_1 = arith.constant 0 : i32
    return %arg0, %c0_i32, %c0_i32_0 : i32, i32, i32
  }
}

</mosaic_0001>

<bundles_post_ra>
// kernel: tpu_custom_call.1
= control target key start
LH: loop header
LB: loop body
LE: loop exit
PB: predicated region body
PF: predicated region fallthrough
CT: control target
= control target key end

     0   :  { %9 = vsyncpa [#allocation3], 0  ;;  %s1671_s0 = inlined_call_operand.vmem [shape: bf16[2,12,1088], index: 0, kind: input, shape index: {}]   ;;  %s1672_s1 = inlined_call_operand.vmem [shape: bf16[3,4,12], index: 1, kind: input, shape index: {}]   ;;  %s1673_s2 = inlined_call_operand.vmem [shape: f32[2,4,1], index: 2, kind: input, shape index: {}]   ;;  %s1674_s3 = inlined_call_operand.vmem [shape: f32[2,4,1], index: 3, kind: input, shape index: {}]   ;;  %s1675_s4 = inlined_call_operand.hbm [shape: bf16[2,4,1024], index: 4, kind: output, shape index: {}]  }
   0x1   :  { %11 = vsyncpa [#allocation3 + $0x1], 0  ;;  %s1401_s15 = smov 0   ;;  %s1403_s16 = smov 0  }
   0x2   :  { %s1405_s17 = smov 0   ;;  %s1407_s18 = smov 0  }
   0x3 LB: > { %s1422_s19 = sadd.s32 4294967295, %s1369_s18   ;;  %s1161_s20 = sadd.s32 4294967294, %s1369_s18   ;;  %s1369_s18 = sphi %s1407_s18, %s1681_s18   ;;  %s1365_s17 = sphi %s1405_s17, %s1680_s17   ;;  %s1361_s16 = sphi %s1403_s16, %s1679_s16   ;;  %s1357_s15 = sphi %s1401_s15, %s1678_s15  }
   0x4   : > { %s1426_s21 = sadd.s32 1, %s1369_s18   ;;  %s123_s22 = sadd.s32 1, %s1365_s17 }
   0x5   : > { %s120_s23 = ssub.s32 %s1369_s18, %s1426_s21  ;;  %p133_p0 = scmp.ne.s32.totalorder %s1365_s17, %s1361_s16 }
   0x6   : > { %p121_p1 = scmp.eq.s32.totalorder %s120_s23, 0  ;;  %p134_p2 = scmp.eq.s32.totalorder %s1422_s19, 1 }
   0x7   : > { %p139_p3 = scmp.ne.s32.totalorder %s1361_s16, %s1357_s15  ;;  %p140_p4 = scmp.eq.s32.totalorder %s1161_s20, 1 }
   0x8   : > { %s1437_s24 = scalar_select %p121_p1, %s1365_s17, %s123_s22  }
   0x9   : > { %p1439_p5 = por %p134_p2, %p133_p0  ;;  %p1443_p6 = por %p140_p4, %p139_p3 }
   0xa   : > { %p1164_p7 = scmp.ge.s32.totalorder %s1369_s18, 1  ;;  %p183_p8 = scmp.lt.s32.totalorder %s1369_s18, 3 }
   0xc   : > { %p184_p9 = pnand %p1164_p7, %p183_p8 }
   0xd   : > { %p217_p10 = scmp.lt.s32.totalorder (!%p184_p9), %s1422_s19, 1  ;;  %v1371_v0 = vmov (!%p184_p9), 0   ;;  %s1372_s6 = smov (!%p184_p9), 96   ;;  %vm299_vm0 = vcmask (!%p184_p9), 785408   ;;  %vm312_vm1 = vcmask (!%p184_p9), 1045504   ;;  %vm308_vm2 = vcmask (!%p184_p9), 97280  }
   0xe   : > { %187 = sbr.rel (%p184_p9) target bundleno = 734 (0x2de), region = 36  ;;  %369 = vmatprep.mubr.bf16.mxu0 (!%p184_p9), %v1371_v0  ;;  %410 = vmatprep.mubr.bf16.mxu1 (!%p184_p9), %v1371_v0  ;;  %s1373_s7 = smov (!%p184_p9), 64   ;;  %v1169_v18 = vld [vmem:[%s1672_s1 + $0x2] sm:$0x3] (!%p184_p9)  ;;  %vm712_vm3 = vcmask (!%p184_p9), 523264   ;;  %vm920_vm4 = vcmask (!%p184_p9), 1043456  }
   0xf   : > { %1290 = vset.pattern.permute.xlu0 (!%p184_p9), %v1371_v0  ;;  %1291 = vset.pattern.permute.xlu1 (!%p184_p9), %v1371_v0  ;;  %v231_v37 = vld [vmem:[%s1672_s1] sm:$0x3] (!%p184_p9)  ;;  %v1195_v55 = vld [vmem:[%s1672_s1 + $0x4] sm:$0x3] (!%p184_p9)  ;;  %s1375_s13 = smov (!%p184_p9), [#allocation2]  }
  0x15   : > { %s1451_s27 = scalar_select %p217_p10, %s1422_s19, 1 }
  0x17   : > { %s1246_s28 = smul.u32 72, %s1451_s27  ;;  %s1167_s14 = sshll.u32 %s1451_s27, 2 }
  0x18   : > { %s229_s23 = scalar_lea.vmem %s1674_s3, %s1167_s14  ;;  %s225_s30 = scalar_lea.vmem %s1673_s2, %s1167_s14 }
  0x19   : > { %s221_s5 = scalar_lea.vmem %s1671_s0, %s1246_s28  ;;  %s214_s27 = sand.u32 1, %s1361_s16  }
  0x1a   : > { %v1461_v1 = vld [vmem:[%s221_s5 + $0x8] ss:$36 sps:$4 sm:$0x3f]   ;;  %v1463_v2 = vld [vmem:[%s221_s5] ss:$36 sps:$4 sm:$0x3f]  }
  0x1b   : > { %285 = vrot.lane.b32.xlu1 %v1461_v1, %s1372_s6  ;;  %v1466_v3 = vld [vmem:[%s221_s5 + $0xc] ss:$36 sps:$4 sm:$0x3f]   ;;  %281 = vrot.lane.b32.xlu0 %v1463_v2, %s1372_s6  ;;  %v1297_v4 = vld [vmem:[%s221_s5 + $0x4] ss:$36 sps:$4 sm:$0x3f]  }
  0x1c   : > { %v1469_v5 = vld [vmem:[%s221_s5 + $0x14] ss:$36 sps:$4 sm:$0x3f]   ;;  %v1475_v7 = vld [vmem:[%s221_s5 + $0x1c] ss:$36 sps:$4 sm:$0x3f]  }
  0x1d   : > { %v1472_v6 = vld [vmem:[%s221_s5 + $0x10] ss:$36 sps:$4 sm:$0x3f]   ;;  %v1478_v8 = vld [vmem:[%s221_s5 + $0x18] ss:$36 sps:$4 sm:$0x3f]  }
  0x1e   : > { %v1304_v9 = vld [vmem:[%s221_s5 + $0x20] ss:$36 sps:$4 sm:$0x3f]   ;;  %v505_v31 = vsel %vm312_vm1, %v1463_v2, 0  ;;  %v511_v35 = vsel %vm312_vm1, %v1461_v1, 0  ;;  %v517_v39 = vsel %vm312_vm1, %v1472_v6, 0 }
  0x1f   : > { %287 = vrot.lane.b32.xlu1 %v1466_v3, %s1372_s6  ;;  %283 = vrot.lane.b32.xlu0 %v1297_v4, %s1372_s6  ;;  %v523_v42 = vsel %vm312_vm1, %v1478_v8, 0  ;;  %s1165_s5 = sshll.u32 %s214_s27, 4  ;;  %s1311_s14 = sshll.u32 %s1375_s13, 4  ;;  %s1312_s14 = int_to_ptr.vmem [resolvable:$false] %s1311_s14 }
  0x20   : > { %s1313_s20 = scalar_lea.vmem %s1312_s14, 512 }
  0x23   : > { %291 = vrot.lane.b32.xlu1 %v1469_v5, %s1372_s6  ;;  %289 = vrot.lane.b32.xlu0 %v1472_v6, %s1372_s6 }
  0x27   : > { %295 = vrot.lane.b32.xlu1 %v1475_v7, %s1372_s6  ;;  %293 = vrot.lane.b32.xlu0 %v1478_v8, %s1372_s6 }
  0x2b   : > { %694 = vrot.lane.b32.xlu1 %v1463_v2, %s1373_s7  ;;  %297 = vrot.lane.b32.xlu0 %v1304_v9, %s1372_s6  ;;  %s1213_s6 = sshll.u32 %s1422_s19, 8  ;;  %s1064_s19 = scalar_lea.sflag [#allocation3], %s214_s27 }
  0x2c   : > { %s1627_s11 = scalar_lea.hbm %s1675_s4, %s1213_s6 }
  0x2f   : > { %698 = vrot.lane.b32.xlu1 %v1461_v1, %s1373_s7  ;;  %696 = vrot.lane.b32.xlu0 %v1297_v4, %s1373_s7 }
  0x33   : > { %702 = vrot.lane.b32.xlu1 %v1472_v6, %s1373_s7  ;;  %700 = vrot.lane.b32.xlu0 %v1466_v3, %s1373_s7 }
  0x37   : > { %706 = vrot.lane.b32.xlu1 %v1478_v8, %s1373_s7  ;;  %704 = vrot.lane.b32.xlu0 %v1469_v5, %s1373_s7 }
  0x3b   : > { %710 = vrot.lane.b32.xlu1 %v1304_v9, %s1373_s7  ;;  %708 = vrot.lane.b32.xlu0 %v1475_v7, %s1373_s7  ;;  %s216_s7 = scalar_lea.vmem [#allocation2], %s1165_s5 }
  0x3c   : > { %s1078_s8 = sshll.u32 %s216_s7, 4  ;;  %s1629_s8 = int_to_ptr.vmem [resolvable:$true] %s1078_s8 }
  0x3d   : > { %s1307_s12 = scalar_lea.vmem %s1629_s8, 256  ;;  %p1314_p0 = scmp.lt.s32.totalorder %s1629_s8, %s1312_s14 }
  0x3e   : > { %p1308_p11 = scmp.ne.s32.totalorder %s1629_s8, %s1307_s12  ;;  %p1315_p1 = scmp.lt.s32.totalorder %s1313_s20, %s1307_s12 }
  0x40   : > { %p1309_p12 = pnand %p1308_p11, %p1439_p5  ;;  %p1316_p2 = por %p1315_p1, %p1314_p0 }
  0x42   : > { %p1310_p13 = pneg %p1309_p12 }
  0x44   : > { %p1317_p3 = pnand %p1316_p2, %p1310_p13 }
  0x8d   : > { %v286_v10 = vpop.permute.xlu1 %285  ;;  %v282_v11 = vpop.permute.xlu0 %281 }
  0x91   : > { %v288_v12 = vpop.permute.xlu1 %287  ;;  %v284_v13 = vpop.permute.xlu0 %283 }
  0x92   : > { %v301_v14 = vsel %vm299_vm0, %v284_v13, %v286_v10  ;;  %v300_v15 = vsel %vm299_vm0, %v282_v11, %v284_v13  ;;  %v302_v19 = vsel %vm299_vm0, %v286_v10, %v288_v12 }
  0x93   : > { %1179 = vmatprep.subr.msk.bf16.mxu0 %vm312_vm1, %v301_v14  ;;  %v314_v16 = vsel %vm312_vm1, %v300_v15, 0  ;;  %v320_v22 = vsel %vm312_vm1, %v302_v19, 0 }
  0x94   : > { %338 = vmatpush1.bf16.msra.mxu0 %v314_v16 }
  0x95   : > { %v292_v17 = vpop.permute.xlu1 %291  ;;  %v290_v20 = vpop.permute.xlu0 %289 }
  0x96   : > { %v303_v21 = vsel %vm299_vm0, %v288_v12, %v290_v20  ;;  %v304_v23 = vsel %vm299_vm0, %v290_v20, %v292_v17 }
  0x97   : > { %1180 = vmatmul.mubr.msk.bf16.vlgmr.msra.gmra.mrb[0].mxu0 %vm308_vm2, %v1169_v18  ;;  %1181 = vmatprep.subr.msk.bf16.mxu1 %vm312_vm1, %v303_v21  ;;  %v326_v27 = vsel %vm312_vm1, %v304_v23, 0 }
  0x98   : > { %379 = vmatpush1.bf16.msra.mxu1 %v320_v22  ;;  %451 = vmatprep.mubr.bf16.mxu0 %v1371_v0 }
  0x99   : > { %v296_v24 = vpop.permute.xlu1 %295  ;;  %v294_v25 = vpop.permute.xlu0 %293 }
  0x9a   : > { %v305_v26 = vsel %vm299_vm0, %v292_v17, %v294_v25  ;;  %v306_v28 = vsel %vm299_vm0, %v294_v25, %v296_v24 }
  0x9b   : > { %1182 = vmatmul.mubr.msk.bf16.vlgmr.msra.gmra.mrb[0].mxu1 %vm308_vm2, %v1169_v18  ;;  %1183 = vmatprep.subr.msk.bf16.mxu0 %vm312_vm1, %v305_v26  ;;  %v332_v33 = vsel %vm312_vm1, %v306_v28, 0 }
  0x9c   : > { %420 = vmatpush1.bf16.msra.mxu0 %v326_v27  ;;  %492 = vmatprep.mubr.bf16.mxu1 %v1371_v0 }
  0x9d   : > { %v695_v29 = vpop.permute.xlu1 %694  ;;  %v298_v30 = vpop.permute.xlu0 %297  ;;  %1187 = vmatprep.subr.msk.bf16.mxu0 %vm312_vm1, %v1297_v4 }
  0x9e   : > { %v307_v32 = vsel %vm299_vm0, %v296_v24, %v298_v30 }
  0x9f   : > { %1184 = vmatmul.mubr.msk.bf16.vlgmr.msra.gmra.mrb[4].mxu0 %vm308_vm2, %v1169_v18  ;;  %1185 = vmatprep.subr.msk.bf16.mxu1 %vm312_vm1, %v307_v32 }
  0xa0   : > { %461 = vmatpush1.bf16.msra.mxu1 %v332_v33  ;;  %529 = vmatpush1.bf16.msra.mxu0 %v505_v31 }
  0xa1   : > { %v699_v34 = vpop.permute.xlu1 %698  ;;  %560 = vmatprep.mubr.bf16.mxu0 %v1371_v0  ;;  %1189 = vmatprep.subr.msk.bf16.mxu1 %vm312_vm1, %v1466_v3  ;;  %v697_v36 = vpop.permute.xlu0 %696 }
  0xa2   : > { %1191 = vmatprep.subr.msk.bf16.mxu0 %vm312_vm1, %v1469_v5  ;;  %v714_v41 = vsel %vm712_vm3, %v697_v36, %v699_v34  ;;  %v713_v45 = vsel %vm712_vm3, %v695_v29, %v697_v36 }
  0xa3   : > { %1186 = vmatmul.mubr.msk.bf16.vlgmr.msra.gmra.mrb[4].mxu1 %vm308_vm2, %v1169_v18  ;;  %v725_v47 = vsel %vm312_vm1, %v713_v45, 0 }
  0xa4   : > { %570 = vmatpush1.bf16.msra.mxu1 %v511_v35  ;;  %601 = vmatprep.mubr.bf16.mxu1 %v1371_v0 }
  0xa5   : > { %v703_v38 = vpop.permute.xlu1 %702  ;;  %1193 = vmatprep.subr.msk.bf16.mxu1 %vm312_vm1, %v1475_v7  ;;  %v701_v40 = vpop.permute.xlu0 %700 }
  0xa6   : > { %v716_v46 = vsel %vm712_vm3, %v701_v40, %v703_v38  ;;  %v715_v48 = vsel %vm712_vm3, %v699_v34, %v701_v40 }
  0xa7   : > { %1188 = vmatmul.mubr.msk.bf16.vlgmr.msra.gmra.mrb[0].mxu0 %vm308_vm2, %v231_v37  ;;  %v731_v52 = vsel %vm312_vm1, %v715_v48, 0 }
  0xa8   : > { %611 = vmatpush1.bf16.msra.mxu0 %v517_v39  ;;  %642 = vmatprep.mubr.bf16.mxu0 %v1371_v0 }
  0xa9   : > { %1196 = vmatprep.subr.msk.bf16.mxu0 %vm312_vm1, %v714_v41  ;;  %v707_v43 = vpop.permute.xlu1 %706  ;;  %v705_v44 = vpop.permute.xlu0 %704 }
  0xaa   : > { %v718_v49 = vsel %vm712_vm3, %v705_v44, %v707_v43  ;;  %v717_v53 = vsel %vm712_vm3, %v703_v38, %v705_v44 }
  0xab   : > { %1190 = vmatmul.mubr.msk.bf16.vlgmr.msra.gmra.mrb[0].mxu1 %vm308_vm2, %v231_v37  ;;  %v737_v56 = vsel %vm312_vm1, %v717_v53, 0 }
  0xac   : > { %652 = vmatpush1.bf16.msra.mxu1 %v523_v42  ;;  %683 = vmatprep.mubr.bf16.mxu1 %v1371_v0 }
  0xad   : > { %1198 = vmatprep.subr.msk.bf16.mxu1 %vm312_vm1, %v716_v46  ;;  %v711_v50 = vpop.permute.xlu1 %710  ;;  %v709_v51 = vpop.permute.xlu0 %708 }
  0xae   : > { %v720_v54 = vsel %vm712_vm3, %v709_v51, %v711_v50  ;;  %v719_v57 = vsel %vm712_vm3, %v707_v43, %v709_v51 }
  0xaf   : > { %1192 = vmatmul.mubr.msk.bf16.vlgmr.msra.gmra.mrb[4].mxu0 %vm308_vm2, %v231_v37  ;;  %v743_v58 = vsel %vm312_vm1, %v719_v57, 0  ;;  %v968_v57 = vld [vmem:[%s229_s23] sm:$0xf] }
  0xb0   : > { %749 = vmatpush1.bf16.msra.mxu0 %v725_v47  ;;  %780 = vmatprep.mubr.bf16.mxu0 %v1371_v0 }
  0xb1   : > { %1200 = vmatprep.subr.msk.bf16.mxu0 %vm312_vm1, %v718_v49 }
  0xb3   : > { %1194 = vmatmul.mubr.msk.bf16.vlgmr.msra.gmra.mrb[4].mxu1 %vm308_vm2, %v231_v37 }
  0xb4   : > { %790 = vmatpush1.bf16.msra.mxu1 %v731_v52  ;;  %821 = vmatprep.mubr.bf16.mxu1 %v1371_v0 }
  0xb5   : > { %1202 = vmatprep.subr.msk.bf16.mxu1 %vm312_vm1, %v720_v54 }
  0xb7   : > { %1197 = vmatmul.mubr.msk.bf16.vlgmr.msra.gmra.mrb[0].mxu0 %vm308_vm2, %v1195_v55 }
  0xb8   : > { %831 = vmatpush1.bf16.msra.mxu0 %v737_v56  ;;  %862 = vmatprep.mubr.bf16.mxu0 %v1371_v0 }
  0xbb   : > { %1199 = vmatmul.mubr.msk.bf16.vlgmr.msra.gmra.mrb[0].mxu1 %vm308_vm2, %v1195_v55 }
  0xbc   : > { %872 = vmatpush1.bf16.msra.mxu1 %v743_v58  ;;  %903 = vmatprep.mubr.bf16.mxu1 %v1371_v0 }
  0xbf   : > { %1201 = vmatmul.mubr.msk.bf16.vlgmr.msra.gmra.mrb[4].mxu0 %vm308_vm2, %v1195_v55 }
  0xc3   : > { %1203 = vmatmul.mubr.msk.bf16.vlgmr.msra.gmra.mrb[4].mxu1 %vm308_vm2, %v1195_v55 }
 0x18a   : > { %v1567_v59 = vpop.f32.mrb[0].mxu0 }
 0x18b   : > { %v921_v60 = vsel %vm920_vm4, %v1567_v59, 0.0  ;;  %v938_v61 = vmul.f32 %v1567_v59, %v1567_v59  ;;  %v1573_v62 = vpop.f32.mrb[1].mxu0 }
 0x18c   : > { %v922_v63 = vsel %vm920_vm4, %v1573_v62, 0.0  ;;  %v939_v0 = vmul.f32 %v1573_v62, %v1573_v62  ;;  %v786_v1 = vpop.f32.mrb[2].mxu0 }
 0x18d   : > { %v946_v2 = vsel %vm920_vm4, %v938_v61, 0.0  ;;  %v923_v3 = vadd.f32 %v922_v63, %v921_v60  ;;  %v787_v4 = vpop.f32.mrb[3].mxu0  ;;  %v972_v61 = vld [vmem:[%s225_s30] sm:$0xf]  ;;  %v1374_v1 = vmov 1983009808  }
 0x18e   : > { %v947_v5 = vsel %vm920_vm4, %v939_v0, 0.0  ;;  %v1581_v6 = vpop.f32.mrb[0].mxu1 }
 0x18f   : > { %v948_v7 = vadd.f32 %v947_v5, %v946_v2  ;;  %v924_v8 = vsel %vm920_vm4, %v1581_v6, 0.0  ;;  %v940_v9 = vmul.f32 %v1581_v6, %v1581_v6  ;;  %v1587_v10 = vpop.f32.mrb[1].mxu1  ;;  %v1028_v2 = vunpack.c.l.s4 %v1374_v1 }
 0x190   : > { %v925_v11 = vadd.f32 %v924_v8, %v923_v3  ;;  %v926_v12 = vsel %vm920_vm4, %v1587_v10, 0.0  ;;  %v941_v13 = vmul.f32 %v1587_v10, %v1587_v10  ;;  %v827_v14 = vpop.f32.mrb[2].mxu1  ;;  %v1030_v3 = vlaneseq }
 0x191   : > { %v949_v15 = vsel %vm920_vm4, %v940_v9, 0.0  ;;  %v828_v16 = vpop.f32.mrb[3].mxu1  ;;  %v1029_v4 = vunpack.c.0.s8 %v1028_v2 }
 0x192   : > { %v950_v17 = vadd.f32 %v949_v15, %v948_v7  ;;  %v927_v18 = vadd.f32 %v926_v12, %v925_v11  ;;  %v951_v19 = vsel %vm920_vm4, %v941_v13, 0.0  ;;  %v1595_v20 = vpop.f32.mrb[4].mxu0  ;;  %v1031_v5 = vshrl.u32 %v1030_v3, 7 }
 0x193   : > { %v928_v21 = vsel %vm920_vm4, %v1595_v20, 0.0  ;;  %v942_v22 = vmul.f32 %v1595_v20, %v1595_v20  ;;  %v866_v23 = vpop.f32.mrb[5].mxu0 }
 0x194   : > { %v952_v24 = vadd.f32 %v951_v19, %v950_v17  ;;  %v929_v25 = vadd.f32 %v928_v21, %v927_v18  ;;  %v930_v26 = vsel %vm920_vm4, %v866_v23, 0.0  ;;  %v943_v27 = vmul.f32 %v866_v23, %v866_v23  ;;  %v868_v28 = vpop.f32.mrb[6].mxu0 }
 0x195   : > { %v953_v29 = vsel %vm920_vm4, %v942_v22, 0.0  ;;  %v869_v30 = vpop.f32.mrb[7].mxu0  ;;  %v1032_v8 = vsub.s32 %v1029_v4, %v1031_v5 }
 0x196   : > { %v954_v31 = vadd.f32 %v953_v29, %v952_v24  ;;  %v931_v32 = vadd.f32 %v930_v26, %v929_v25  ;;  %v955_v33 = vsel %vm920_vm4, %v943_v27, 0.0  ;;  %v905_v34 = vpop.f32.mrb[4].mxu1 }
 0x197   : > { %v932_v35 = vsel %vm920_vm4, %v905_v34, 0.0  ;;  %v944_v36 = vmul.f32 %v905_v34, %v905_v34  ;;  %v907_v37 = vpop.f32.mrb[5].mxu1 }
 0x198   : > { %v945_v38 = vmul.f32 %v907_v37, %v907_v37  ;;  %v909_v39 = vpop.f32.mrb[6].mxu1  ;;  %v933_v40 = vadd.f32 %v932_v35, %v931_v32  ;;  %v934_v41 = vsel %vm920_vm4, %v907_v37, 0.0  ;;  %v956_v42 = vadd.f32 %v955_v33, %v954_v31 }
 0x199   : > { %v910_v43 = vpop.f32.mrb[7].mxu1  ;;  %v957_v44 = vsel %vm920_vm4, %v944_v36, 0.0 }
 0x19a   : > { %v935_v45 = vadd.f32 %v934_v41, %v933_v40  ;;  %v958_v46 = vadd.f32 %v957_v44, %v956_v42  ;;  %v959_v47 = vsel %vm920_vm4, %v945_v38, 0.0 }
 0x19c   : > { %936 = vadd.xlane.f32.xlu0 %v935_v45  ;;  %v960_v48 = vadd.f32 %v959_v47, %v958_v46 }
 0x19e   : > { %961 = vadd.xlane.f32.xlu1 %v960_v48 }
 0x229   : > { %v937_v49 = vpop.xlane.xlu0 %936 }
 0x22a   : > { %v963_v50 = vmul.f32 0.0009765625, %v937_v49 }
 0x22b   : > { %v962_v51 = vpop.xlane.xlu1 %961 }
 0x22c   : > { %v965_v52 = vmul.f32 %v963_v50, %v963_v50  ;;  %v964_v53 = vmul.f32 0.0009765625, %v962_v51 }
 0x22e   : > { %v966_v54 = vsub.f32 %v964_v53, %v965_v52 }
 0x230   : > { %v967_v55 = vmax.f32 %v966_v54, 0.0 }
 0x232   : > { %v969_v56 = vadd.f32 1e-05, %v967_v55 }
 0x234   : > { %1305 = vrsqrt.f32 %v969_v56 }
 0x23e   : > { %v1306_v58 = vpop.eup %1305 }
 0x23f   : > { %v971_v60 = vmul.f32 %v1306_v58, %v968_v57 }
 0x241   : > { %977 = vperm.xlu0 %1290, %v971_v60   ;;  %v973_v63 = vmul.f32 %v971_v60, %v963_v50 }
 0x243   : > { %v974_v0 = vsub.f32 %v972_v61, %v973_v63 }
 0x245   : > { %990 = vperm.xlu1 %1291, %v974_v0  }
 0x2c0   : > { %v978_v7 = vpop.permute.xlu0 %977 }
 0x2c1   : > { %v980_v9 = vmul.f32 %v978_v7, %v1567_v59  ;;  %v981_v11 = vmul.f32 %v978_v7, %v1573_v62  ;;  %v982_v12 = vmul.f32 %v978_v7, %v1581_v6  ;;  %v983_v13 = vmul.f32 %v978_v7, %v1587_v10 }
 0x2c2   : > { %v984_v14 = vmul.f32 %v978_v7, %v1595_v20  ;;  %v985_v15 = vmul.f32 %v978_v7, %v866_v23  ;;  %v986_v16 = vmul.f32 %v978_v7, %v905_v34  ;;  %v987_v17 = vmul.f32 %v978_v7, %v907_v37 }
 0x2c4   : > { %v991_v18 = vpop.permute.xlu1 %990 }
 0x2c5   : > { %v993_v19 = vadd.f32 %v991_v18, %v980_v9  ;;  %v994_v21 = vadd.f32 %v991_v18, %v981_v11  ;;  %v995_v22 = vadd.f32 %v991_v18, %v982_v12  ;;  %v996_v24 = vadd.f32 %v991_v18, %v983_v13 }
 0x2c6   : > { %v997_v25 = vadd.f32 %v991_v18, %v984_v14  ;;  %v998_v59 = vadd.f32 %v991_v18, %v985_v15  ;;  %v999_v26 = vadd.f32 %v991_v18, %v986_v16  ;;  %v1000_v62 = vadd.f32 %v991_v18, %v987_v17 }
 0x2c7   : > { %v1001_v6 = vmax.f32 %v993_v19, 0.0  ;;  %v1002_v27 = vmax.f32 %v994_v21, 0.0  ;;  %v1003_v10 = vmax.f32 %v995_v22, 0.0  ;;  %v1004_v28 = vmax.f32 %v996_v24, 0.0 }
 0x2c8   : > { %v1005_v20 = vmax.f32 %v997_v25, 0.0  ;;  %v1006_v23 = vmax.f32 %v998_v59, 0.0  ;;  %v1007_v29 = vmax.f32 %v999_v26, 0.0  ;;  %v1008_v30 = vmax.f32 %v1000_v62, 0.0 }
 0x2c9   : > { %v1204_v31 = vpack.c.bf16 %v1002_v27, %v1001_v6  ;;  %v1205_v32 = vpack.c.bf16 %v1004_v28, %v1003_v10 }
 0x2ca   : > { %v1206_v33 = vpack.c.bf16 %v1006_v23, %v1005_v20  ;;  %v1207_v34 = vpack.c.bf16 %v1008_v30, %v1007_v29 }
 0x2cb   : > { %v1033_v35 = vrot.slane %v1204_v31, %v1032_v8  ;;  %v1040_v36 = vrot.slane %v1205_v32, %v1032_v8 }
 0x2cc   : > { %v1050_v37 = vrot.slane %v1206_v33, %v1032_v8  ;;  %v1057_v38 = vrot.slane %v1207_v34, %v1032_v8 }
 0x2cd   : > { %v1041_v39 = vcombine.low %v1033_v35, %v1040_v36 }
 0x2ce   : > { %v1058_v40 = vcombine.low %v1050_v37, %v1057_v38 }
 0x2cf   : > { %1061 = vst [vmem:[%s216_s7] sm:$0xff] %v1041_v39 }
 0x2d0   : > { %1062 = vst [vmem:[%s216_s7 + $0x8] sm:$0xff] %v1058_v40 }
 0x2d1   : > { %1320 = shalt.err (!%p1317_p3)
}
 0x2d2   : > { %s1321_s22 = scalar_lea.hbm %s1627_s11, 256  ;;  %s1325_s29 = scalar_lea.hbm %s1675_s4, 512 }
 0x2d3   : > { %p1322_p4 = scmp.ne.s32.totalorder %s1627_s11, %s1321_s22  ;;  %p1326_p9 = scmp.lt.u32.totalorder %s1627_s11, %s1675_s4 }
 0x2d4   : > { %p1327_p10 = scmp.lt.u32.totalorder %s1325_s29, %s1321_s22  ;;  %p1329_p12 = scmp.lt.u32.totalorder %s1321_s22, %s1627_s11 }
 0x2d5   : > { %p1323_p7 = pnand %p1322_p4, %p1439_p5 }
 0x2d6   : > { %p1328_p11 = por %p1327_p10, %p1326_p9 }
 0x2d7   : > { %p1324_p8 = pneg %p1323_p7 }
 0x2d8   : > { %p1330_p13 = por %p1329_p12, %p1328_p11 }
 0x2da   : > { %p1331_p0 = pnand %p1330_p13, %p1324_p8 }
 0x2dc   : > { %1334 = shalt.err (!%p1331_p0)
}
 0x2dd   : > { %1247 = dma.vmem_to_hbm [thread:$0]  (%p1439_p5), %s1629_s8, 256, %s1627_s11, %s1064_s19  }
 0x2de PF: > { %p1253_p1 = scmp.ge.s32.totalorder %s1369_s18, 2  ;;  %s1090_s5 = sand.u32 1, %s1357_s15  }
 0x2df   : > { %s1091_s6 = scalar_lea.sflag [#allocation3], %s1090_s5 }
 0x2e0   : > { %p1250_p2 = pnand %p1253_p1, %p1443_p6 }
 0x2e2   : > { %1352 = dma.done.wait (!%p1250_p2), %s1091_s6, 256  }
 0x2e3   : > { %1354 = vsyncadd (!%p1250_p2), %s1091_s6, 4294967040  ;;  %p14_p3 = scmp.ge.s32.totalorder %s1426_s21, 4   ;;  %s1678_s15 = smov %s1361_s16 }
 0x2e4   : > { %s1679_s16 = smov %s1365_s17  ;;  %s1680_s17 = smov %s1437_s24 }
 0x2e5   : > { %s1681_s18 = smov %s1426_s21  ;;  %16 = sbr.rel (!%p14_p3) target bundleno = 3 (0x3), region = 79 }
 0x2ec   :  { %1096 = vsyncpa [#allocation3], 1 }
 0x2ed   :  { %1098 = vsyncpa [#allocation3 + $0x1], 1 }

</bundles_post_ra>
